<compile_context>
chip_gen: v5e
topology: v5e:2x2
jax: 0.10.0
libtpu: 0.0.40
codegen_flags: <defaults>
</compile_context>

<pallas_src>
import jax
import jax.numpy as jnp
from jax.experimental import pallas as pl
from jax.experimental.pallas import tpu as pltpu


def _round_up(n, m):
    return ((n + m - 1) // m) * m


def _vmem_capacity_bytes():
    """Physical VMEM per TensorCore, with a conservative fallback."""
    try:
        info = pltpu.get_tpu_info()
        cap = getattr(info, "vmem_capacity_bytes", None)
        if cap:
            return int(cap)
    except Exception:
        pass
    return 64 * 1024 * 1024  # v7x-sized conservative default


def _make_kernel(n_chunks, chunk):
    """Kernel with the fc1 output (N) dimension chunked in `chunk` columns."""

    def adversarial_kernel(x_ref, w1_ref, b1_ref, w2_ref, b2_ref, o_ref):
        x = x_ref[...]                                     # (TB, Hp), mm dtype
        tb = x.shape[0]
        acc = jnp.zeros((1, tb), jnp.float32)              # lane-dense partial logits
        for j in range(n_chunks):                          # static, fully unrolled
            lo = j * chunk
            hi = lo + chunk
            # fc1 slice on the MXU: (TB, Hp) @ (Hp, chunk), f32 accumulation.
            h = jnp.dot(x, w1_ref[:, lo:hi],
                        preferred_element_type=jnp.float32)
            # Bias + ReLU on the VPU in f32.
            h = jnp.maximum(h + b1_ref[:, lo:hi], 0.0)
            # fc2 slice as elementwise multiply + cross-lane reduce (VPU/XLU)
            # instead of an N=1 MXU matmul.
            acc = acc + jnp.sum(h * w2_ref[:, lo:hi], axis=-1)[None, :]
        logits = acc + b2_ref[0]                           # (1, TB), lane-dense
        o_ref[...] = jax.nn.sigmoid(logits).astype(o_ref.dtype)

    return adversarial_kernel


def pack_adversarial_params(w1, b1, w2, b2, *, compute_dtype=jnp.bfloat16):
    """Pad/cast the weights once (call outside the hot loop).

    w1: (H, H) input-major; b1: (H,)/(1,H); w2: (H,1)/(H,); b2: scalar/(1,)/(1,1).
    compute_dtype: dtype of the fc1 matmul operands (w1 and, at call time, x).
    """
    H = w1.shape[0]
    Hp = _round_up(H, 256)           # clean MXU K/N cadence, (8,128)-aligned
    mm_dtype = jnp.dtype(compute_dtype)

    w1_p = jnp.pad(w1.astype(mm_dtype), ((0, Hp - H), (0, Hp - H)))
    b1_p = jnp.pad(jnp.reshape(b1, (1, H)).astype(jnp.float32),
                   ((0, 0), (0, Hp - H)))
    w2_p = jnp.pad(jnp.reshape(w2, (1, H)).astype(jnp.float32),
                   ((0, 0), (0, Hp - H)))
    b2_p = jnp.reshape(b2, (1,)).astype(jnp.float32)

    return {"w1": w1_p, "b1": b1_p, "w2": w2_p, "b2": b2_p,
            "H": H, "Hp": Hp, "mm_dtype": mm_dtype}


def adversarial_forward(x, params, *, tile_b=512):
    """sigmoid(relu(x @ w1 + b1) @ w2 + b2), weights pre-packed by
    pack_adversarial_params.  x: (B, H).  Returns (B, 1) with x.dtype."""
    B, H = x.shape
    assert H == params["H"], "x hidden dim does not match packed params"
    Hp = params["Hp"]
    mm_dtype = params["mm_dtype"]
    out_dtype = x.dtype

    # Batch tiling: clamp the tile to the (128-rounded) batch so tiny batches
    # don't pay for a full 512-row tile of junk FLOPs.
    assert tile_b % 128 == 0, "tile_b should be a multiple of 128 (lane-dense)"
    tile_b = min(tile_b, _round_up(B, 128))
    Bp = _round_up(B, tile_b)
    n_tiles = Bp // tile_b

    # fc1 N-chunk size (static, must divide Hp; Hp is a multiple of 256).
    chunk = 512 if Hp % 512 == 0 else 256
    n_chunks = Hp // chunk

    # Only the activation is padded per call (zero padding is exact: padded
    # features/neurons contribute nothing through fc1/ReLU/fc2).
    x_p = jnp.pad(x.astype(mm_dtype), ((0, Bp - B), (0, Hp - H)))

    # VMEM budget: w1/b1/w2 resident (single copy), x tile double-buffered,
    # one f32 h chunk, lane-dense output slab.  2x margin, capped at ~85% of
    # the chip's physical VMEM.
    mm_bytes = jnp.dtype(mm_dtype).itemsize
    est = (Hp * Hp * mm_bytes            # w1 (resident, single copy)
           + 2 * Hp * 4                  # b1 + w2 row
           + 2 * tile_b * Hp * mm_bytes  # x tile, double-buffered
           + tile_b * chunk * 4          # h chunk intermediate (f32)
           + 4 * tile_b * 4)             # accumulator + output slab (dbl-buf)
    vmem_cap = int(_vmem_capacity_bytes() * 0.85)
    vmem_limit = int(min(vmem_cap, max(32 * 1024 * 1024, 2 * est)))

    kernel = _make_kernel(n_chunks, chunk)

    out = pl.pallas_call(
        kernel,
        out_shape=jax.ShapeDtypeStruct((1, Bp), jnp.float32),
        grid_spec=pltpu.PrefetchScalarGridSpec(
            num_scalar_prefetch=0,
            grid=(n_tiles,),
            in_specs=[
                # x: batch-tiled, pipelined (double-buffered) stream.
                pl.BlockSpec((tile_b, Hp), lambda i: (i, 0)),
                # Resident operands: whole array in VMEM, single copy.
                pl.BlockSpec(memory_space=pltpu.MemorySpace.VMEM),   # w1
                pl.BlockSpec(memory_space=pltpu.MemorySpace.VMEM),   # b1
                pl.BlockSpec(memory_space=pltpu.MemorySpace.VMEM),   # w2 row
                # b2: scalar in SMEM (no padded VMEM tile / DMA stream).
                pl.BlockSpec(memory_space=pltpu.MemorySpace.SMEM),
            ],
            # Lane-dense output: batch index lives in the lane dimension.
            out_specs=pl.BlockSpec((1, tile_b), lambda i: (0, i)),
        ),
        compiler_params=pltpu.CompilerParams(
            dimension_semantics=("parallel",),
            vmem_limit_bytes=vmem_limit,
        ),
    )(x_p, params["w1"], params["b1"], params["w2"], params["b2"])

    # (1, Bp) lane-dense slab -> (B, 1) in the module's layout.
    return out[0, :B].reshape(B, 1).astype(out_dtype)


if __name__ == "__main__":
    # Small shapes consistent with the module (hidden_layer shrunk from 2000;
    # deliberately not 128-aligned to exercise the padding path).
    B, H = 16, 200
    key = jax.random.PRNGKey(0)
    kx, k1, kb1, k2, kb2 = jax.random.split(key, 5)

    x = jax.random.normal(kx, (B, H), dtype=jnp.float32)

    # Deterministic parameter init (PyTorch Linear-style bounds, synthetic).
    bound = 1.0 / (H ** 0.5)
    w1 = jax.random.uniform(k1, (H, H), jnp.float32, -bound, bound)   # (in, out)
    b1 = jax.random.uniform(kb1, (H,), jnp.float32, -bound, bound)
    w2 = jax.random.uniform(k2, (H, 1), jnp.float32, -bound, bound)   # (in, out)
    b2 = jax.random.uniform(kb2, (1,), jnp.float32, -bound, bound)

    # Pure-JAX reference.
    h_ref = jnp.maximum(x @ w1 + b1[None, :], 0.0)
    ref = jax.nn.sigmoid(h_ref @ w2 + b2)

    # f32 path: exact-semantics check at tight tolerance.
    params_f32 = pack_adversarial_params(w1, b1, w2, b2,
                                         compute_dtype=jnp.float32)
    out_f32 = jax.block_until_ready(adversarial_forward(x, params_f32))
    assert out_f32.shape == (B, 1)
    assert jnp.allclose(out_f32, ref, atol=1e-5, rtol=1e-5), \
        float(jnp.max(jnp.abs(out_f32 - ref)))

    # Default (bf16 matmul operands) path: looser tolerance from the bf16 cast
    # of x/w1; accumulation and activation math are still f32.
    params_bf16 = pack_adversarial_params(w1, b1, w2, b2)
    out_bf16 = jax.block_until_ready(adversarial_forward(x, params_bf16))
    assert out_bf16.shape == (B, 1)
    assert jnp.allclose(out_bf16, ref, atol=2e-2, rtol=0.0), \
        float(jnp.max(jnp.abs(out_bf16 - ref)))

    print("KERNEL_OK")
</pallas_src>

<mosaic_0001>
module attributes {stable_mosaic.version = 11 : i64} {
  func.func @adversarial_kernel(%arg0: i32, %arg1: memref<128x256xf32, #tpu.memory_space<vmem>>, %arg2: memref<256x256xf32, #tpu.memory_space<vmem>>, %arg3: memref<1x256xf32, #tpu.memory_space<vmem>>, %arg4: memref<1x256xf32, #tpu.memory_space<vmem>>, %arg5: memref<1xf32, #tpu.memory_space<smem>>, %arg6: memref<1x128xf32, #tpu.memory_space<vmem>>) attributes {dimension_semantics = [#tpu.dimension_semantics<parallel>], iteration_bounds = array<i64: 1>, scalar_prefetch = 0 : i64, scratch_operands = 0 : i64, tpu.core_type = #tpu.core_type<tc>, window_params = [{transform_indices = @transform_0, window_bounds = array<i64: 128, 256>}, {pipeline_mode = #tpu.pipeline_mode<synchronous>, transform_indices = @transform_1, window_bounds = array<i64: 256, 256>}, {pipeline_mode = #tpu.pipeline_mode<synchronous>, transform_indices = @transform_2, window_bounds = array<i64: 1, 256>}, {pipeline_mode = #tpu.pipeline_mode<synchronous>, transform_indices = @transform_3, window_bounds = array<i64: 1, 256>}, {transform_indices = @transform_4, window_bounds = array<i64: 1>}, {transform_indices = @transform_5, window_bounds = array<i64: 1, 128>}]} {
    %c0 = arith.constant 0 : index
    %c0_0 = arith.constant 0 : index
    %0 = vector.load %arg1[%c0, %c0_0] : memref<128x256xf32, #tpu.memory_space<vmem>>, vector<128x256xf32>
    %cst = arith.constant 0.000000e+00 : f32
    %1 = vector.broadcast %cst : f32 to vector<1x128xf32>
    %c0_1 = arith.constant 0 : index
    %c0_2 = arith.constant 0 : index
    %2 = vector.load %arg2[%c0_1, %c0_2] : memref<256x256xf32, #tpu.memory_space<vmem>>, vector<256x256xf32>
    %cst_3 = arith.constant dense<0.000000e+00> : vector<128x256xf32>
    %3 = tpu.matmul %0, %2, %cst_3 {dimension_numbers = #tpu.dot_dimension_numbers<[1], [0], [0], [1], [0, 0, 1, 1], [], []>} : vector<128x256xf32>, vector<256x256xf32>, vector<128x256xf32> -> vector<128x256xf32>
    %c0_4 = arith.constant 0 : index
    %c0_5 = arith.constant 0 : index
    %4 = vector.load %arg3[%c0_4, %c0_5] : memref<1x256xf32, #tpu.memory_space<vmem>>, vector<1x256xf32>
    %5 = vector.broadcast %4 : vector<1x256xf32> to vector<128x256xf32>
    %6 = arith.addf %3, %5 : vector<128x256xf32>
    %cst_6 = arith.constant 0.000000e+00 : f32
    %7 = vector.broadcast %cst_6 : f32 to vector<128x256xf32>
    %8 = arith.maximumf %6, %7 : vector<128x256xf32>
    %c0_7 = arith.constant 0 : index
    %c0_8 = arith.constant 0 : index
    %9 = vector.load %arg4[%c0_7, %c0_8] : memref<1x256xf32, #tpu.memory_space<vmem>>, vector<1x256xf32>
    %10 = vector.broadcast %9 : vector<1x256xf32> to vector<128x256xf32>
    %11 = arith.mulf %8, %10 : vector<128x256xf32>
    %cst_9 = arith.constant dense<0.000000e+00> : vector<128xf32>
    %12 = vector.multi_reduction <add>, %11, %cst_9 [1] : vector<128x256xf32> to vector<128xf32>
    %13 = vector.shape_cast %12 : vector<128xf32> to vector<1x128xf32>
    %14 = arith.addf %1, %13 : vector<1x128xf32>
    %c0_10 = arith.constant 0 : index
    %15 = memref.load %arg5[%c0_10] : memref<1xf32, #tpu.memory_space<smem>>
    %16 = vector.broadcast %15 : f32 to vector<1x128xf32>
    %17 = arith.addf %14, %16 : vector<1x128xf32>
    %18 = arith.negf %17 : vector<1x128xf32>
    %19 = math.exp %18 : vector<1x128xf32>
    %cst_11 = arith.constant 1.000000e+00 : f32
    %20 = vector.broadcast %cst_11 : f32 to vector<1x128xf32>
    %21 = arith.addf %20, %19 : vector<1x128xf32>
    %22 = arith.divf %20, %21 : vector<1x128xf32>
    %c0_12 = arith.constant 0 : index
    %c0_13 = arith.constant 0 : index
    %23 = vector.load %arg6[%c0_12, %c0_13] : memref<1x128xf32, #tpu.memory_space<vmem>>, vector<1x128xf32>
    tpu.vector_store %arg6[%c0_12, %c0_13], %22 {strides = array<i32>} : memref<1x128xf32, #tpu.memory_space<vmem>>, vector<1x128xf32>,
    return
  }
  func.func @transform_0(%arg0: i32) -> (i32, i32) {
    %c0_i32 = arith.constant 0 : i32
    %c0_i32_0 = arith.constant 0 : i32
    return %arg0, %c0_i32 : i32, i32
  }
  func.func @transform_1(%arg0: i32) -> (i32, i32) {
    %c0_i32 = arith.constant 0 : i32
    %c0_i32_0 = arith.constant 0 : i32
    %c0_i32_1 = arith.constant 0 : i32
    return %c0_i32, %c0_i32_0 : i32, i32
  }
  func.func @transform_2(%arg0: i32) -> (i32, i32) {
    %c0_i32 = arith.constant 0 : i32
    %c0_i32_0 = arith.constant 0 : i32
    %c0_i32_1 = arith.constant 0 : i32
    return %c0_i32, %c0_i32_0 : i32, i32
  }
  func.func @transform_3(%arg0: i32) -> (i32, i32) {
    %c0_i32 = arith.constant 0 : i32
    %c0_i32_0 = arith.constant 0 : i32
    %c0_i32_1 = arith.constant 0 : i32
    return %c0_i32, %c0_i32_0 : i32, i32
  }
  func.func @transform_4(%arg0: i32) -> i32 {
    %c0_i32 = arith.constant 0 : i32
    %c0_i32_0 = arith.constant 0 : i32
    return %c0_i32 : i32
  }
  func.func @transform_5(%arg0: i32) -> (i32, i32) {
    %c0_i32 = arith.constant 0 : i32
    %c0_i32_0 = arith.constant 0 : i32
    return %c0_i32, %arg0 : i32, i32
  }
}

</mosaic_0001>

<bundles_post_ra>
// kernel: tpu_custom_call.1
= control target key start
LH: loop header
LB: loop body
LE: loop exit
PB: predicated region body
PF: predicated region fallthrough
CT: control target
= control target key end

     0   :  { %11 = vsyncpa [#allocation4], 0  ;;  %s1711_s0 = inlined_call_operand.hbm [shape: f32[128,256], index: 0, kind: input, shape index: {}]   ;;  %s1712_s1 = inlined_call_operand.hbm [shape: f32[256,256], index: 1, kind: input, shape index: {}]   ;;  %s1713_s2 = inlined_call_operand.vmem [shape: f32[1,256], index: 2, kind: input, shape index: {}]   ;;  %s1714_s3 = inlined_call_operand.vmem [shape: f32[1,256], index: 3, kind: input, shape index: {}]   ;;  %s1715_s4 = inlined_call_operand.<no memory space> [shape: f32[1], index: 4, kind: input, shape index: {}]   ;;  %s1716_s5 = inlined_call_operand.hbm [shape: f32[1,128], index: 5, kind: output, shape index: {}]  }
   0x1   :  { %12 = vsyncpa [#allocation7], 0 }
   0x2   :  { %13 = vsyncpa [#allocation5], 0  ;;  %s18_s20 = sshll.u32 %s1711_s0, 4  ;;  %s1134_s21 = smov [#allocation3]   ;;  %s19_s20 = int_to_ptr.hbm [resolvable:$true] %s18_s20 }
   0x3   :  { %s20_s22 = sshll.u32 %s1134_s21, 4  ;;  %s31_s25 = sshll.u32 %s1712_s1, 4  ;;  %s21_s22 = int_to_ptr.vmem [resolvable:$true] %s20_s22  ;;  %s32_s25 = int_to_ptr.hbm [resolvable:$true] %s31_s25 }
   0x4   :  { %s1135_s26 = smov 256   ;;  %s1136_s27 = smov 16  }
   0x5   :  { %26 = dma.hbm_to_vmem [thread:$0]  %s19_s20, 4096, %s21_s22, [#allocation4], %s1135_s26, %s1135_s26, %s1136_s27  }
   0x6   :  { %s1137_s28 = smov [#allocation6]  }
   0x7   :  { %s33_s29 = sshll.u32 %s1137_s28, 4  ;;  %s34_s29 = int_to_ptr.vmem [resolvable:$true] %s33_s29 }
   0x8   :  { %39 = dma.hbm_to_vmem [thread:$0]  %s32_s25, 8192, %s34_s29, [#allocation7], %s1135_s26, %s1135_s26, %s1136_s27  }
   0x9   :  { %1128 = dma.done.wait [#allocation4], 4096  }
   0xa   :  { %1129 = vsyncadd [#allocation4], 4294963200 }
   0xb   :  { %1130 = dma.done.wait [#allocation7], 8192  }
   0xc   :  { %1131 = vsyncadd [#allocation7], 4294959104  ;;  %v117_v0 = vld [vmem:[#allocation6 + $0xf8] sm:$0xff]  ;;  %v115_v1 = vld [vmem:[#allocation6 + $0xe8] sm:$0xff]  ;;  %vm893_vm7 = vcmask 130112   ;;  %vm897_vm11 = vcmask 195712  }
   0xd   :  { %v149_v2 = vld [vmem:[#allocation6 + $0x1f8] sm:$0xff]  ;;  %286 = vmatpush.msra.mxu2 %v117_v0  ;;  %v147_v3 = vld [vmem:[#allocation6 + $0x1e8] sm:$0xff]  ;;  %v116_v4 = vld [vmem:[#allocation6 + $0xf0] sm:$0xff]  ;;  %s960_s10 = sshll.u32 %s1716_s5, 4  ;;  %s961_s10 = int_to_ptr.hbm [resolvable:$true] %s960_s10 }
   0xe   :  { %351 = vmatpush.msra.mxu3 %v149_v2  ;;  %v113_v5 = vld [vmem:[#allocation6 + $0xd8] sm:$0xff]  ;;  %156 = vmatpush.msra.mxu0 %v116_v4  ;;  %v114_v7 = vld [vmem:[#allocation6 + $0xe0] sm:$0xff]  ;;  %v111_v8 = vld [vmem:[#allocation6 + $0xc8] sm:$0xff] }
   0xf   :  { %v145_v6 = vld [vmem:[#allocation6 + $0x1d8] sm:$0xff]  ;;  %287 = vmatpush.msra.mxu2 %v115_v1  ;;  %v148_v9 = vld [vmem:[#allocation6 + $0x1f0] sm:$0xff]  ;;  %v143_v10 = vld [vmem:[#allocation6 + $0x1c8] sm:$0xff] }
  0x10   :  { %352 = vmatpush.msra.mxu3 %v147_v3  ;;  %157 = vmatpush.msra.mxu0 %v114_v7  ;;  %v112_v11 = vld [vmem:[#allocation6 + $0xd0] sm:$0xff]  ;;  %v146_v12 = vld [vmem:[#allocation6 + $0x1e0] sm:$0xff]  ;;  %v109_v15 = vld [vmem:[#allocation6 + $0xb8] sm:$0xff] }
  0x11   :  { %221 = vmatpush.msra.mxu1 %v148_v9  ;;  %288 = vmatpush.msra.mxu2 %v113_v5  ;;  %v110_v13 = vld [vmem:[#allocation6 + $0xc0] sm:$0xff]  ;;  %v144_v14 = vld [vmem:[#allocation6 + $0x1d0] sm:$0xff]  ;;  %v141_v16 = vld [vmem:[#allocation6 + $0x1b8] sm:$0xff] }
  0x12   :  { %353 = vmatpush.msra.mxu3 %v145_v6  ;;  %158 = vmatpush.msra.mxu0 %v112_v11  ;;  %v108_v17 = vld [vmem:[#allocation6 + $0xb0] sm:$0xff]  ;;  %v142_v18 = vld [vmem:[#allocation6 + $0x1c0] sm:$0xff]  ;;  %v107_v19 = vld [vmem:[#allocation6 + $0xa8] sm:$0xff] }
  0x13   :  { %222 = vmatpush.msra.mxu1 %v146_v12  ;;  %289 = vmatpush.msra.mxu2 %v111_v8  ;;  %v139_v20 = vld [vmem:[#allocation6 + $0x1a8] sm:$0xff]  ;;  %v106_v21 = vld [vmem:[#allocation6 + $0xa0] sm:$0xff]  ;;  %v140_v22 = vld [vmem:[#allocation6 + $0x1b0] sm:$0xff] }
  0x14   :  { %354 = vmatpush.msra.mxu3 %v143_v10  ;;  %159 = vmatpush.msra.mxu0 %v110_v13  ;;  %v105_v23 = vld [vmem:[#allocation6 + $0x98] sm:$0xff]  ;;  %v104_v25 = vld [vmem:[#allocation6 + $0x90] sm:$0xff]  ;;  %v138_v26 = vld [vmem:[#allocation6 + $0x1a0] sm:$0xff] }
  0x15   :  { %223 = vmatpush.msra.mxu1 %v144_v14  ;;  %290 = vmatpush.msra.mxu2 %v109_v15  ;;  %v137_v24 = vld [vmem:[#allocation6 + $0x198] sm:$0xff]  ;;  %v103_v27 = vld [vmem:[#allocation6 + $0x88] sm:$0xff]  ;;  %v102_v29 = vld [vmem:[#allocation6 + $0x80] sm:$0xff] }
  0x16   :  { %355 = vmatpush.msra.mxu3 %v141_v16  ;;  %160 = vmatpush.msra.mxu0 %v108_v17  ;;  %v135_v28 = vld [vmem:[#allocation6 + $0x188] sm:$0xff]  ;;  %v136_v30 = vld [vmem:[#allocation6 + $0x190] sm:$0xff]  ;;  %v101_v31 = vld [vmem:[#allocation6 + $0x78] sm:$0xff] }
  0x17   :  { %224 = vmatpush.msra.mxu1 %v142_v18  ;;  %291 = vmatpush.msra.mxu2 %v107_v19  ;;  %v133_v32 = vld [vmem:[#allocation6 + $0x178] sm:$0xff]  ;;  %v100_v33 = vld [vmem:[#allocation6 + $0x70] sm:$0xff]  ;;  %v134_v34 = vld [vmem:[#allocation6 + $0x180] sm:$0xff] }
  0x18   :  { %356 = vmatpush.msra.mxu3 %v139_v20  ;;  %161 = vmatpush.msra.mxu0 %v106_v21  ;;  %v99_v35 = vld [vmem:[#allocation6 + $0x68] sm:$0xff]  ;;  %v98_v37 = vld [vmem:[#allocation6 + $0x60] sm:$0xff]  ;;  %v132_v38 = vld [vmem:[#allocation6 + $0x170] sm:$0xff] }
  0x19   :  { %225 = vmatpush.msra.mxu1 %v140_v22  ;;  %292 = vmatpush.msra.mxu2 %v105_v23  ;;  %v131_v36 = vld [vmem:[#allocation6 + $0x168] sm:$0xff]  ;;  %v97_v39 = vld [vmem:[#allocation6 + $0x58] sm:$0xff]  ;;  %v96_v41 = vld [vmem:[#allocation6 + $0x50] sm:$0xff] }
  0x1a   :  { %357 = vmatpush.msra.mxu3 %v137_v24  ;;  %162 = vmatpush.msra.mxu0 %v104_v25  ;;  %v129_v40 = vld [vmem:[#allocation6 + $0x158] sm:$0xff]  ;;  %v130_v42 = vld [vmem:[#allocation6 + $0x160] sm:$0xff]  ;;  %v95_v43 = vld [vmem:[#allocation6 + $0x48] sm:$0xff] }
  0x1b   :  { %226 = vmatpush.msra.mxu1 %v138_v26  ;;  %293 = vmatpush.msra.mxu2 %v103_v27  ;;  %v127_v44 = vld [vmem:[#allocation6 + $0x148] sm:$0xff]  ;;  %v94_v45 = vld [vmem:[#allocation6 + $0x40] sm:$0xff]  ;;  %v128_v46 = vld [vmem:[#allocation6 + $0x150] sm:$0xff] }
  0x1c   :  { %358 = vmatpush.msra.mxu3 %v135_v28  ;;  %163 = vmatpush.msra.mxu0 %v102_v29  ;;  %v93_v47 = vld [vmem:[#allocation6 + $0x38] sm:$0xff]  ;;  %v92_v49 = vld [vmem:[#allocation6 + $0x30] sm:$0xff]  ;;  %v126_v50 = vld [vmem:[#allocation6 + $0x140] sm:$0xff] }
  0x1d   :  { %227 = vmatpush.msra.mxu1 %v136_v30  ;;  %294 = vmatpush.msra.mxu2 %v101_v31  ;;  %v125_v48 = vld [vmem:[#allocation6 + $0x138] sm:$0xff]  ;;  %v91_v51 = vld [vmem:[#allocation6 + $0x28] sm:$0xff]  ;;  %v90_v53 = vld [vmem:[#allocation6 + $0x20] sm:$0xff] }
  0x1e   :  { %359 = vmatpush.msra.mxu3 %v133_v32  ;;  %164 = vmatpush.msra.mxu0 %v100_v33  ;;  %v123_v52 = vld [vmem:[#allocation6 + $0x128] sm:$0xff]  ;;  %v124_v54 = vld [vmem:[#allocation6 + $0x130] sm:$0xff]  ;;  %v89_v55 = vld [vmem:[#allocation6 + $0x18] sm:$0xff] }
  0x1f   :  { %228 = vmatpush.msra.mxu1 %v134_v34  ;;  %295 = vmatpush.msra.mxu2 %v99_v35  ;;  %v121_v56 = vld [vmem:[#allocation6 + $0x118] sm:$0xff]  ;;  %v88_v57 = vld [vmem:[#allocation6 + $0x10] sm:$0xff]  ;;  %v122_v58 = vld [vmem:[#allocation6 + $0x120] sm:$0xff] }
  0x20   :  { %360 = vmatpush.msra.mxu3 %v131_v36  ;;  %165 = vmatpush.msra.mxu0 %v98_v37  ;;  %v87_v59 = vld [vmem:[#allocation6 + $0x8] sm:$0xff]  ;;  %v54_v61 = vld [vmem:[#allocation3] sm:$0xff]  ;;  %v120_v0 = vld [vmem:[#allocation6 + $0x110] sm:$0xff] }
  0x21   :  { %229 = vmatpush.msra.mxu1 %v132_v38  ;;  %296 = vmatpush.msra.mxu2 %v97_v39  ;;  %v119_v60 = vld [vmem:[#allocation6 + $0x108] sm:$0xff]  ;;  %v86_v63 = vld [vmem:[#allocation6] sm:$0xff]  ;;  %v56_v2 = vld [vmem:[#allocation3 + $0x10] sm:$0xff] }
  0x22   :  { %361 = vmatpush.msra.mxu3 %v129_v40  ;;  %166 = vmatpush.msra.mxu0 %v96_v41  ;;  %v55_v62 = vld [vmem:[#allocation3 + $0x8] sm:$0xff]  ;;  %v118_v1 = vld [vmem:[#allocation6 + $0x100] sm:$0xff]  ;;  %v57_v3 = vld [vmem:[#allocation3 + $0x18] sm:$0xff] }
  0x23   :  { %230 = vmatpush.msra.mxu1 %v130_v42  ;;  %297 = vmatpush.msra.mxu2 %v95_v43  ;;  %v58_v4 = vld [vmem:[#allocation3 + $0x20] sm:$0xff]  ;;  %v59_v5 = vld [vmem:[#allocation3 + $0x28] sm:$0xff]  ;;  %v60_v6 = vld [vmem:[#allocation3 + $0x30] sm:$0xff] }
  0x24   :  { %362 = vmatpush.msra.mxu3 %v127_v44  ;;  %167 = vmatpush.msra.mxu0 %v94_v45  ;;  %v61_v7 = vld [vmem:[#allocation3 + $0x38] sm:$0xff]  ;;  %v62_v8 = vld [vmem:[#allocation3 + $0x40] sm:$0xff]  ;;  %v63_v9 = vld [vmem:[#allocation3 + $0x48] sm:$0xff] }
  0x25   :  { %231 = vmatpush.msra.mxu1 %v128_v46  ;;  %298 = vmatpush.msra.mxu2 %v93_v47  ;;  %v64_v10 = vld [vmem:[#allocation3 + $0x50] sm:$0xff]  ;;  %v65_v11 = vld [vmem:[#allocation3 + $0x58] sm:$0xff]  ;;  %v66_v12 = vld [vmem:[#allocation3 + $0x60] sm:$0xff] }
  0x26   :  { %363 = vmatpush.msra.mxu3 %v125_v48  ;;  %168 = vmatpush.msra.mxu0 %v92_v49  ;;  %v67_v13 = vld [vmem:[#allocation3 + $0x68] sm:$0xff]  ;;  %v68_v14 = vld [vmem:[#allocation3 + $0x70] sm:$0xff]  ;;  %v69_v15 = vld [vmem:[#allocation3 + $0x78] sm:$0xff] }
  0x27   :  { %232 = vmatpush.msra.mxu1 %v126_v50  ;;  %299 = vmatpush.msra.mxu2 %v91_v51  ;;  %v70_v16 = vld [vmem:[#allocation3 + $0x80] sm:$0xff]  ;;  %v71_v17 = vld [vmem:[#allocation3 + $0x88] sm:$0xff]  ;;  %v72_v18 = vld [vmem:[#allocation3 + $0x90] sm:$0xff] }
  0x28   :  { %364 = vmatpush.msra.mxu3 %v123_v52  ;;  %169 = vmatpush.msra.mxu0 %v90_v53  ;;  %v73_v19 = vld [vmem:[#allocation3 + $0x98] sm:$0xff]  ;;  %v74_v20 = vld [vmem:[#allocation3 + $0xa0] sm:$0xff]  ;;  %v75_v21 = vld [vmem:[#allocation3 + $0xa8] sm:$0xff] }
  0x29   :  { %233 = vmatpush.msra.mxu1 %v124_v54  ;;  %300 = vmatpush.msra.mxu2 %v89_v55  ;;  %v76_v22 = vld [vmem:[#allocation3 + $0xb0] sm:$0xff]  ;;  %v77_v23 = vld [vmem:[#allocation3 + $0xb8] sm:$0xff]  ;;  %v78_v24 = vld [vmem:[#allocation3 + $0xc0] sm:$0xff] }
  0x2a   :  { %365 = vmatpush.msra.mxu3 %v121_v56  ;;  %170 = vmatpush.msra.mxu0 %v88_v57  ;;  %v79_v25 = vld [vmem:[#allocation3 + $0xc8] sm:$0xff]  ;;  %v80_v26 = vld [vmem:[#allocation3 + $0xd0] sm:$0xff]  ;;  %v81_v27 = vld [vmem:[#allocation3 + $0xd8] sm:$0xff] }
  0x2b   :  { %234 = vmatpush.msra.mxu1 %v122_v58  ;;  %301 = vmatpush.msra.mxu2 %v87_v59  ;;  %v82_v28 = vld [vmem:[#allocation3 + $0xe0] sm:$0xff]  ;;  %v83_v29 = vld [vmem:[#allocation3 + $0xe8] sm:$0xff]  ;;  %v84_v30 = vld [vmem:[#allocation3 + $0xf0] sm:$0xff] }
  0x2c   :  { %366 = vmatpush.msra.mxu3 %v119_v60  ;;  %302 = vmatmul.f32.vlgmr.msra.gmra.mxu2 %v54_v61  ;;  %v85_v31 = vld [vmem:[#allocation3 + $0xf8] sm:$0xff]  ;;  %v150_v32 = vld [vmem:[%s1713_s2] sm:$0x3] }
  0x2d   :  { %367 = vmatmul.f32.vlgmr.msra.gmra.mxu3 %v55_v62  ;;  %171 = vmatpush.msra.mxu0 %v86_v63  ;;  %v1178_v33 = vperm.slane %v150_v32, 0  ;;  %v1181_v36 = vperm.slane %v150_v32, 1  ;;  %v448_v38 = vld [vmem:[%s1714_s3] sm:$0x3] }
  0x2e   :  { %235 = vmatpush.msra.mxu1 %v120_v0  ;;  %172 = vmatmul.f32.vlgmr.msra.gmra.mxu0 %v54_v61  ;;  %v1187_v44 = vperm.slane %v448_v38, 0  ;;  %v1189_v46 = vperm.slane %v448_v38, 1 }
  0x30   :  { %236 = vmatpush.msra.mxu1 %v118_v1 }
  0x31   :  { %237 = vmatmul.f32.vlgmr.msra.gmra.mxu1 %v55_v62 }
  0x34   :  { %305 = vmatmul.f32.gmra.mxu2 %v56_v2 }
  0x35   :  { %370 = vmatmul.f32.gmra.mxu3 %v57_v3 }
  0x36   :  { %175 = vmatmul.f32.gmra.mxu0 %v56_v2 }
  0x39   :  { %240 = vmatmul.f32.gmra.mxu1 %v57_v3 }
  0x3c   :  { %308 = vmatmul.f32.gmra.mxu2 %v58_v4 }
  0x3d   :  { %373 = vmatmul.f32.gmra.mxu3 %v59_v5 }
  0x3e   :  { %178 = vmatmul.f32.gmra.mxu0 %v58_v4 }
  0x41   :  { %243 = vmatmul.f32.gmra.mxu1 %v59_v5 }
  0x44   :  { %311 = vmatmul.f32.gmra.mxu2 %v60_v6 }
  0x45   :  { %376 = vmatmul.f32.gmra.mxu3 %v61_v7 }
  0x46   :  { %181 = vmatmul.f32.gmra.mxu0 %v60_v6 }
  0x49   :  { %246 = vmatmul.f32.gmra.mxu1 %v61_v7 }
  0x4c   :  { %314 = vmatmul.f32.gmra.mxu2 %v62_v8 }
  0x4d   :  { %379 = vmatmul.f32.gmra.mxu3 %v63_v9 }
  0x4e   :  { %184 = vmatmul.f32.gmra.mxu0 %v62_v8 }
  0x51   :  { %249 = vmatmul.f32.gmra.mxu1 %v63_v9 }
  0x54   :  { %317 = vmatmul.f32.gmra.mxu2 %v64_v10 }
  0x55   :  { %382 = vmatmul.f32.gmra.mxu3 %v65_v11 }
  0x56   :  { %187 = vmatmul.f32.gmra.mxu0 %v64_v10 }
  0x59   :  { %252 = vmatmul.f32.gmra.mxu1 %v65_v11 }
  0x5c   :  { %320 = vmatmul.f32.gmra.mxu2 %v66_v12 }
  0x5d   :  { %385 = vmatmul.f32.gmra.mxu3 %v67_v13 }
  0x5e   :  { %190 = vmatmul.f32.gmra.mxu0 %v66_v12 }
  0x61   :  { %255 = vmatmul.f32.gmra.mxu1 %v67_v13 }
  0x64   :  { %323 = vmatmul.f32.gmra.mxu2 %v68_v14 }
  0x65   :  { %388 = vmatmul.f32.gmra.mxu3 %v69_v15 }
  0x66   :  { %193 = vmatmul.f32.gmra.mxu0 %v68_v14 }
  0x69   :  { %258 = vmatmul.f32.gmra.mxu1 %v69_v15 }
  0x6c   :  { %326 = vmatmul.f32.gmra.mxu2 %v70_v16 }
  0x6d   :  { %391 = vmatmul.f32.gmra.mxu3 %v71_v17 }
  0x6e   :  { %196 = vmatmul.f32.gmra.mxu0 %v70_v16 }
  0x71   :  { %261 = vmatmul.f32.gmra.mxu1 %v71_v17 }
  0x74   :  { %329 = vmatmul.f32.gmra.mxu2 %v72_v18 }
  0x75   :  { %394 = vmatmul.f32.gmra.mxu3 %v73_v19 }
  0x76   :  { %199 = vmatmul.f32.gmra.mxu0 %v72_v18 }
  0x79   :  { %264 = vmatmul.f32.gmra.mxu1 %v73_v19 }
  0x7c   :  { %332 = vmatmul.f32.gmra.mxu2 %v74_v20 }
  0x7d   :  { %397 = vmatmul.f32.gmra.mxu3 %v75_v21 }
  0x7e   :  { %202 = vmatmul.f32.gmra.mxu0 %v74_v20 }
  0x81   :  { %267 = vmatmul.f32.gmra.mxu1 %v75_v21 }
  0x84   :  { %335 = vmatmul.f32.gmra.mxu2 %v76_v22 }
  0x85   :  { %400 = vmatmul.f32.gmra.mxu3 %v77_v23 }
  0x86   :  { %205 = vmatmul.f32.gmra.mxu0 %v76_v22 }
  0x89   :  { %270 = vmatmul.f32.gmra.mxu1 %v77_v23 }
  0x8c   :  { %338 = vmatmul.f32.gmra.mxu2 %v78_v24 }
  0x8d   :  { %403 = vmatmul.f32.gmra.mxu3 %v79_v25 }
  0x8e   :  { %208 = vmatmul.f32.gmra.mxu0 %v78_v24 }
  0x91   :  { %273 = vmatmul.f32.gmra.mxu1 %v79_v25 }
  0x94   :  { %341 = vmatmul.f32.gmra.mxu2 %v80_v26 }
  0x95   :  { %406 = vmatmul.f32.gmra.mxu3 %v81_v27 }
  0x96   :  { %211 = vmatmul.f32.gmra.mxu0 %v80_v26 }
  0x99   :  { %276 = vmatmul.f32.gmra.mxu1 %v81_v27 }
  0x9c   :  { %344 = vmatmul.f32.gmra.mxu2 %v82_v28 }
  0x9d   :  { %409 = vmatmul.f32.gmra.mxu3 %v83_v29 }
  0x9e   :  { %214 = vmatmul.f32.gmra.mxu0 %v82_v28 }
  0xa1   :  { %279 = vmatmul.f32.gmra.mxu1 %v83_v29 }
  0xa4   :  { %347 = vmatmul.f32.gmra.mxu2 %v84_v30 }
  0xa5   :  { %412 = vmatmul.f32.gmra.mxu3 %v85_v31 }
  0xa6   :  { %217 = vmatmul.f32.gmra.mxu0 %v84_v30 }
  0xa9   :  { %282 = vmatmul.f32.gmra.mxu1 %v85_v31 }
  0xab   :  { %v173_v34 = vpop.f32.mrf.mxu0 }
  0xac   :  { %v174_v35 = vadd.f32 %v173_v34, %v1178_v33 }
  0xae   :  { %v238_v37 = vpop.f32.mrf.mxu1 }
  0xaf   :  { %v239_v39 = vadd.f32 %v238_v37, %v174_v35  ;;  %v303_v40 = vpop.f32.mrf.mxu2 }
  0xb0   :  { %v368_v41 = vpop.f32.mrf.mxu3  ;;  %v304_v42 = vadd.f32 %v303_v40, %v1181_v36 }
  0xb1   :  { %v416_v43 = vmax.f32 %v239_v39, 0.0 }
  0xb2   :  { %v369_v45 = vadd.f32 %v368_v41, %v304_v42 }
  0xb3   :  { %v176_v47 = vpop.f32.mrf.mxu0  ;;  %v454_v50 = vmul.f32 %v1187_v44, %v416_v43 }
  0xb4   :  { %v417_v48 = vmax.f32 %v369_v45, 0.0  ;;  %v177_v49 = vadd.f32 %v176_v47, %v1178_v33 }
  0xb6   :  { %v241_v51 = vpop.f32.mrf.mxu1  ;;  %v455_v53 = vmul.f32 %v1189_v46, %v417_v48 }
  0xb7   :  { %v242_v52 = vadd.f32 %v241_v51, %v177_v49  ;;  %v306_v54 = vpop.f32.mrf.mxu2 }
  0xb8   :  { %v371_v55 = vpop.f32.mrf.mxu3  ;;  %v307_v56 = vadd.f32 %v306_v54, %v1181_v36  ;;  %v486_v58 = vadd.f32 %v455_v53, %v454_v50 }
  0xb9   :  { %v418_v57 = vmax.f32 %v242_v52, 0.0 }
  0xba   :  { %v372_v59 = vadd.f32 %v371_v55, %v307_v56  ;;  %487 = vadd.xlane.f32.xlu0 %v486_v58 }
  0xbb   :  { %v179_v60 = vpop.f32.mrf.mxu0  ;;  %v456_v61 = vmul.f32 %v1187_v44, %v418_v57 }
  0xbc   :  { %v419_v62 = vmax.f32 %v372_v59, 0.0  ;;  %v180_v63 = vadd.f32 %v179_v60, %v1178_v33 }
  0xbe   :  { %v244_v0 = vpop.f32.mrf.mxu1  ;;  %v457_v1 = vmul.f32 %v1189_v46, %v419_v62 }
  0xbf   :  { %v245_v2 = vadd.f32 %v244_v0, %v180_v63  ;;  %v309_v3 = vpop.f32.mrf.mxu2 }
  0xc0   :  { %v374_v4 = vpop.f32.mrf.mxu3  ;;  %v310_v5 = vadd.f32 %v309_v3, %v1181_v36  ;;  %v489_v7 = vadd.f32 %v457_v1, %v456_v61 }
  0xc1   :  { %v420_v6 = vmax.f32 %v245_v2, 0.0 }
  0xc2   :  { %v375_v8 = vadd.f32 %v374_v4, %v310_v5  ;;  %490 = vadd.xlane.f32.xlu0 %v489_v7 }
  0xc3   :  { %v182_v9 = vpop.f32.mrf.mxu0  ;;  %v458_v12 = vmul.f32 %v1187_v44, %v420_v6 }
  0xc4   :  { %v421_v10 = vmax.f32 %v375_v8, 0.0  ;;  %v183_v11 = vadd.f32 %v182_v9, %v1178_v33 }
  0xc6   :  { %v247_v13 = vpop.f32.mrf.mxu1  ;;  %v459_v15 = vmul.f32 %v1189_v46, %v421_v10 }
  0xc7   :  { %v248_v14 = vadd.f32 %v247_v13, %v183_v11  ;;  %v312_v16 = vpop.f32.mrf.mxu2 }
  0xc8   :  { %v377_v17 = vpop.f32.mrf.mxu3  ;;  %v313_v18 = vadd.f32 %v312_v16, %v1181_v36  ;;  %v492_v20 = vadd.f32 %v459_v15, %v458_v12 }
  0xc9   :  { %v422_v19 = vmax.f32 %v248_v14, 0.0 }
  0xca   :  { %v378_v21 = vadd.f32 %v377_v17, %v313_v18  ;;  %493 = vadd.xlane.f32.xlu1 %v492_v20 }
  0xcb   :  { %v185_v22 = vpop.f32.mrf.mxu0  ;;  %v460_v23 = vmul.f32 %v1187_v44, %v422_v19 }
  0xcc   :  { %v423_v24 = vmax.f32 %v378_v21, 0.0  ;;  %v186_v25 = vadd.f32 %v185_v22, %v1178_v33 }
  0xce   :  { %v250_v26 = vpop.f32.mrf.mxu1  ;;  %v461_v27 = vmul.f32 %v1189_v46, %v423_v24 }
  0xcf   :  { %v251_v28 = vadd.f32 %v250_v26, %v186_v25  ;;  %v315_v29 = vpop.f32.mrf.mxu2 }
  0xd0   :  { %v380_v30 = vpop.f32.mrf.mxu3  ;;  %v316_v31 = vadd.f32 %v315_v29, %v1181_v36  ;;  %v495_v34 = vadd.f32 %v461_v27, %v460_v23 }
  0xd1   :  { %v424_v32 = vmax.f32 %v251_v28, 0.0 }
  0xd2   :  { %v381_v35 = vadd.f32 %v380_v30, %v316_v31  ;;  %496 = vadd.xlane.f32.xlu1 %v495_v34 }
  0xd3   :  { %v188_v37 = vpop.f32.mrf.mxu0  ;;  %v462_v40 = vmul.f32 %v1187_v44, %v424_v32 }
  0xd4   :  { %v425_v38 = vmax.f32 %v381_v35, 0.0  ;;  %v189_v39 = vadd.f32 %v188_v37, %v1178_v33 }
  0xd6   :  { %v253_v41 = vpop.f32.mrf.mxu1  ;;  %v463_v43 = vmul.f32 %v1189_v46, %v425_v38 }
  0xd7   :  { %v254_v42 = vadd.f32 %v253_v41, %v189_v39  ;;  %v318_v45 = vpop.f32.mrf.mxu2 }
  0xd8   :  { %v383_v47 = vpop.f32.mrf.mxu3  ;;  %v319_v48 = vadd.f32 %v318_v45, %v1181_v36  ;;  %v498_v50 = vadd.f32 %v463_v43, %v462_v40 }
  0xd9   :  { %v426_v49 = vmax.f32 %v254_v42, 0.0 }
  0xda   :  { %v384_v51 = vadd.f32 %v383_v47, %v319_v48  ;;  %499 = vadd.xlane.f32.xlu2 %v498_v50 }
  0xdb   :  { %v191_v52 = vpop.f32.mrf.mxu0  ;;  %v464_v53 = vmul.f32 %v1187_v44, %v426_v49 }
  0xdc   :  { %v427_v54 = vmax.f32 %v384_v51, 0.0  ;;  %v192_v55 = vadd.f32 %v191_v52, %v1178_v33 }
  0xde   :  { %v256_v56 = vpop.f32.mrf.mxu1  ;;  %v465_v57 = vmul.f32 %v1189_v46, %v427_v54 }
  0xdf   :  { %v257_v58 = vadd.f32 %v256_v56, %v192_v55  ;;  %v321_v59 = vpop.f32.mrf.mxu2 }
  0xe0   :  { %v386_v60 = vpop.f32.mrf.mxu3  ;;  %v322_v61 = vadd.f32 %v321_v59, %v1181_v36  ;;  %v501_v63 = vadd.f32 %v465_v57, %v464_v53 }
  0xe1   :  { %v428_v62 = vmax.f32 %v257_v58, 0.0 }
  0xe2   :  { %v387_v0 = vadd.f32 %v386_v60, %v322_v61  ;;  %502 = vadd.xlane.f32.xlu2 %v501_v63 }
  0xe3   :  { %v194_v1 = vpop.f32.mrf.mxu0  ;;  %v466_v2 = vmul.f32 %v1187_v44, %v428_v62 }
  0xe4   :  { %v429_v3 = vmax.f32 %v387_v0, 0.0  ;;  %v195_v4 = vadd.f32 %v194_v1, %v1178_v33 }
  0xe6   :  { %v259_v5 = vpop.f32.mrf.mxu1  ;;  %v467_v6 = vmul.f32 %v1189_v46, %v429_v3 }
  0xe7   :  { %v260_v7 = vadd.f32 %v259_v5, %v195_v4  ;;  %v324_v8 = vpop.f32.mrf.mxu2 }
  0xe8   :  { %v389_v9 = vpop.f32.mrf.mxu3  ;;  %v325_v10 = vadd.f32 %v324_v8, %v1181_v36  ;;  %v504_v12 = vadd.f32 %v467_v6, %v466_v2 }
  0xe9   :  { %v430_v11 = vmax.f32 %v260_v7, 0.0 }
  0xea   :  { %v390_v13 = vadd.f32 %v389_v9, %v325_v10  ;;  %505 = vadd.xlane.f32.xlu0 %v504_v12 }
  0xeb   :  { %v197_v14 = vpop.f32.mrf.mxu0  ;;  %v468_v15 = vmul.f32 %v1187_v44, %v430_v11 }
  0xec   :  { %v431_v16 = vmax.f32 %v390_v13, 0.0  ;;  %v198_v17 = vadd.f32 %v197_v14, %v1178_v33 }
  0xee   :  { %v262_v18 = vpop.f32.mrf.mxu1  ;;  %v469_v19 = vmul.f32 %v1189_v46, %v431_v16 }
  0xef   :  { %v263_v20 = vadd.f32 %v262_v18, %v198_v17  ;;  %v327_v21 = vpop.f32.mrf.mxu2 }
  0xf0   :  { %v392_v22 = vpop.f32.mrf.mxu3  ;;  %v328_v23 = vadd.f32 %v327_v21, %v1181_v36  ;;  %v507_v25 = vadd.f32 %v469_v19, %v468_v15 }
  0xf1   :  { %v432_v24 = vmax.f32 %v263_v20, 0.0 }
  0xf2   :  { %v393_v26 = vadd.f32 %v392_v22, %v328_v23  ;;  %508 = vadd.xlane.f32.xlu1 %v507_v25 }
  0xf3   :  { %v200_v27 = vpop.f32.mrf.mxu0  ;;  %v470_v28 = vmul.f32 %v1187_v44, %v432_v24 }
  0xf4   :  { %v433_v29 = vmax.f32 %v393_v26, 0.0  ;;  %v201_v30 = vadd.f32 %v200_v27, %v1178_v33 }
  0xf6   :  { %v265_v31 = vpop.f32.mrf.mxu1  ;;  %v471_v32 = vmul.f32 %v1189_v46, %v433_v29 }
  0xf7   :  { %v266_v34 = vadd.f32 %v265_v31, %v201_v30  ;;  %v330_v35 = vpop.f32.mrf.mxu2 }
  0xf8   :  { %v395_v37 = vpop.f32.mrf.mxu3  ;;  %v331_v38 = vadd.f32 %v330_v35, %v1181_v36  ;;  %v510_v40 = vadd.f32 %v471_v32, %v470_v28 }
  0xf9   :  { %v434_v39 = vmax.f32 %v266_v34, 0.0 }
  0xfa   :  { %v396_v41 = vadd.f32 %v395_v37, %v331_v38  ;;  %511 = vadd.xlane.f32.xlu2 %v510_v40 }
  0xfb   :  { %v203_v42 = vpop.f32.mrf.mxu0  ;;  %v472_v43 = vmul.f32 %v1187_v44, %v434_v39 }
  0xfc   :  { %v435_v45 = vmax.f32 %v396_v41, 0.0  ;;  %v204_v47 = vadd.f32 %v203_v42, %v1178_v33 }
  0xfe   :  { %v268_v48 = vpop.f32.mrf.mxu1  ;;  %v473_v49 = vmul.f32 %v1189_v46, %v435_v45 }
  0xff   :  { %v269_v50 = vadd.f32 %v268_v48, %v204_v47  ;;  %v333_v51 = vpop.f32.mrf.mxu2 }
 0x100   :  { %v398_v52 = vpop.f32.mrf.mxu3  ;;  %v334_v53 = vadd.f32 %v333_v51, %v1181_v36  ;;  %v513_v55 = vadd.f32 %v473_v49, %v472_v43 }
 0x101   :  { %v436_v54 = vmax.f32 %v269_v50, 0.0 }
 0x102   :  { %v399_v56 = vadd.f32 %v398_v52, %v334_v53  ;;  %514 = vadd.xlane.f32.xlu0 %v513_v55 }
 0x103   :  { %v206_v57 = vpop.f32.mrf.mxu0  ;;  %v474_v58 = vmul.f32 %v1187_v44, %v436_v54 }
 0x104   :  { %v437_v59 = vmax.f32 %v399_v56, 0.0  ;;  %v207_v60 = vadd.f32 %v206_v57, %v1178_v33 }
 0x106   :  { %v271_v61 = vpop.f32.mrf.mxu1  ;;  %v475_v62 = vmul.f32 %v1189_v46, %v437_v59 }
 0x107   :  { %v272_v63 = vadd.f32 %v271_v61, %v207_v60  ;;  %v336_v0 = vpop.f32.mrf.mxu2 }
 0x108   :  { %v401_v1 = vpop.f32.mrf.mxu3  ;;  %v337_v2 = vadd.f32 %v336_v0, %v1181_v36  ;;  %v516_v4 = vadd.f32 %v475_v62, %v474_v58 }
 0x109   :  { %v438_v3 = vmax.f32 %v272_v63, 0.0 }
 0x10a   :  { %v402_v5 = vadd.f32 %v401_v1, %v337_v2  ;;  %517 = vadd.xlane.f32.xlu1 %v516_v4  ;;  %v1256_v2 = vstv %s1715_s4  ;;  %s1138_s4 = smov [#allocation8]  }
 0x10b   :  { %v209_v6 = vpop.f32.mrf.mxu0  ;;  %v476_v7 = vmul.f32 %v1187_v44, %v438_v3  ;;  %s958_s7 = sshll.u32 %s1138_s4, 4  ;;  %s959_s7 = int_to_ptr.vmem [resolvable:$true] %s958_s7 }
 0x10c   :  { %v439_v8 = vmax.f32 %v402_v5, 0.0  ;;  %v210_v9 = vadd.f32 %v209_v6, %v1178_v33 }
 0x10e   :  { %v274_v10 = vpop.f32.mrf.mxu1  ;;  %v477_v11 = vmul.f32 %v1189_v46, %v439_v8 }
 0x10f   :  { %v275_v12 = vadd.f32 %v274_v10, %v210_v9  ;;  %v339_v13 = vpop.f32.mrf.mxu2 }
 0x110   :  { %v404_v14 = vpop.f32.mrf.mxu3  ;;  %v340_v15 = vadd.f32 %v339_v13, %v1181_v36  ;;  %v519_v17 = vadd.f32 %v477_v11, %v476_v7 }
 0x111   :  { %v440_v16 = vmax.f32 %v275_v12, 0.0 }
 0x112   :  { %v405_v18 = vadd.f32 %v404_v14, %v340_v15  ;;  %520 = vadd.xlane.f32.xlu2 %v519_v17 }
 0x113   :  { %v212_v19 = vpop.f32.mrf.mxu0  ;;  %v478_v20 = vmul.f32 %v1187_v44, %v440_v16 }
 0x114   :  { %v441_v21 = vmax.f32 %v405_v18, 0.0  ;;  %v213_v22 = vadd.f32 %v212_v19, %v1178_v33 }
 0x116   :  { %v277_v23 = vpop.f32.mrf.mxu1  ;;  %v479_v24 = vmul.f32 %v1189_v46, %v441_v21 }
 0x117   :  { %v278_v25 = vadd.f32 %v277_v23, %v213_v22  ;;  %v342_v26 = vpop.f32.mrf.mxu2 }
 0x118   :  { %v407_v27 = vpop.f32.mrf.mxu3  ;;  %v343_v28 = vadd.f32 %v342_v26, %v1181_v36  ;;  %v522_v30 = vadd.f32 %v479_v24, %v478_v20 }
 0x119   :  { %v442_v29 = vmax.f32 %v278_v25, 0.0 }
 0x11a   :  { %v408_v31 = vadd.f32 %v407_v27, %v343_v28  ;;  %523 = vadd.xlane.f32.xlu0 %v522_v30 }
 0x11b   :  { %v215_v32 = vpop.f32.mrf.mxu0  ;;  %v480_v34 = vmul.f32 %v1187_v44, %v442_v29 }
 0x11c   :  { %v443_v35 = vmax.f32 %v408_v31, 0.0  ;;  %v216_v37 = vadd.f32 %v215_v32, %v1178_v33 }
 0x11e   :  { %v280_v38 = vpop.f32.mrf.mxu1  ;;  %v481_v39 = vmul.f32 %v1189_v46, %v443_v35 }
 0x11f   :  { %v281_v40 = vadd.f32 %v280_v38, %v216_v37  ;;  %v345_v41 = vpop.f32.mrf.mxu2 }
 0x120   :  { %v410_v42 = vpop.f32.mrf.mxu3  ;;  %v346_v43 = vadd.f32 %v345_v41, %v1181_v36  ;;  %v525_v47 = vadd.f32 %v481_v39, %v480_v34 }
 0x121   :  { %v444_v45 = vmax.f32 %v281_v40, 0.0 }
 0x122   :  { %v411_v48 = vadd.f32 %v410_v42, %v346_v43  ;;  %526 = vadd.xlane.f32.xlu1 %v525_v47 }
 0x123   :  { %v218_v49 = vpop.f32.mrf.mxu0  ;;  %v482_v50 = vmul.f32 %v1187_v44, %v444_v45 }
 0x124   :  { %v445_v51 = vmax.f32 %v411_v48, 0.0  ;;  %v219_v52 = vadd.f32 %v218_v49, %v1178_v33  ;;  %v888_v48 = vlaneseq }
 0x126   :  { %v283_v53 = vpop.f32.mrf.mxu1  ;;  %v483_v54 = vmul.f32 %v1189_v46, %v445_v51 }
 0x127   :  { %v284_v55 = vadd.f32 %v283_v53, %v219_v52  ;;  %v348_v56 = vpop.f32.mrf.mxu2 }
 0x128   :  { %v413_v57 = vpop.f32.mrf.mxu3  ;;  %v349_v58 = vadd.f32 %v348_v56, %v1181_v36  ;;  %v528_v60 = vadd.f32 %v483_v54, %v482_v50 }
 0x129   :  { %v446_v59 = vmax.f32 %v284_v55, 0.0 }
 0x12a   :  { %v414_v61 = vadd.f32 %v413_v57, %v349_v58  ;;  %529 = vadd.xlane.f32.xlu2 %v528_v60  ;;  %v1300_v57 = vand.u32 127, %v888_v48 }
 0x12b   :  { %v484_v62 = vmul.f32 %v1187_v44, %v446_v59 }
 0x12c   :  { %v447_v63 = vmax.f32 %v414_v61, 0.0 }
 0x12d   :  { %v488_v33 = vpop.xlane.xlu0 %487 }
 0x12e   :  { %v485_v0 = vmul.f32 %v1189_v46, %v447_v63  ;;  %v552_v36 = vadd.f32 %v1256_v2, %v488_v33  ;;  %v1315_v33 = vadd.s32 4294967288, %v1300_v57 }
 0x130   :  { %v531_v1 = vadd.f32 %v485_v0, %v484_v62  ;;  %v971_v6 = vmul.f32 -1.442695, %v552_v36 }
 0x132   :  { %532 = vadd.xlane.f32.xlu0 %v531_v1  ;;  %992 = vpow2.f32 %v971_v6 }
 0x135   :  { %v491_v3 = vpop.xlane.xlu0 %490 }
 0x136   :  { %v553_v5 = vadd.f32 %v1256_v2, %v491_v3 }
 0x138   :  { %v972_v7 = vmul.f32 -1.442695, %v553_v5  ;;  %v993_v10 = vpop.eup %992 }
 0x139   :  { %v1262_v13 = vadd.f32 1.0, %v993_v10 }
 0x13a   :  { %994 = vpow2.f32 %v972_v7  ;;  %v1332_v7 = vadd.s32 4294967280, %v1300_v57 }
 0x13b   :  { %v641_v58 = vand.u32 2147483647, %v1262_v13  ;;  %v643_v59 = vand.u32 2147483648, %v1262_v13  ;;  %vm637_vm2 = vweird.f32 %v1262_v13 }
 0x13d   :  { %v494_v4 = vpop.xlane.xlu1 %493  ;;  %vm1326_vm4 = vcmp.eq.f32.partialorder %v641_v58, 8.507059e+37 }
 0x13e   :  { %v554_v44 = vadd.f32 %v1256_v2, %v494_v4 }
 0x140   :  { %v973_v8 = vmul.f32 -1.442695, %v554_v44  ;;  %v995_v12 = vpop.eup %994 }
 0x141   :  { %v1264_v15 = vadd.f32 1.0, %v995_v12 }
 0x142   :  { %996 = vpow2.f32 %v973_v8  ;;  %v644_v8 = vor.u32 1.1754944e-38, %v643_v59 }
 0x143   :  { %998 = vrcp.f32 %v1262_v13  ;;  %v658_v62 = vand.u32 2147483648, %v1264_v15  ;;  %vm652_vm5 = vweird.f32 %v1264_v15  ;;  %v656_v10 = vand.u32 2147483647, %v1264_v15 }
 0x145   :  { %v497_v9 = vpop.xlane.xlu1 %496  ;;  %vm657_vm9 = vcmp.eq.f32.partialorder %v656_v10, 8.507059e+37 }
 0x146   :  { %v555_v11 = vadd.f32 %v1256_v2, %v497_v9  ;;  %v1427_v9 = vadd.s32 4294967248, %v1300_v57 }
 0x148   :  { %v974_v14 = vmul.f32 -1.442695, %v555_v11  ;;  %v997_v18 = vpop.eup %996  ;;  %v1342_v11 = vadd.s32 4294967272, %v1300_v57 }
 0x149   :  { %v1270_v21 = vadd.f32 1.0, %v997_v18  ;;  %v1272_v24 = vpop.eup %998 }
 0x14a   :  { %1000 = vpow2.f32 %v974_v14  ;;  %v633_v29 = vmul.f32 %v1272_v24, %v1262_v13  ;;  %vm638_vm0 = vweird.f32 %v1272_v24 }
 0x14b   :  { %1002 = vrcp.f32 %v1264_v15  ;;  %vm1322_vm3 = vmor %vm637_vm2, %vm638_vm0  ;;  %vm667_vm10 = vweird.f32 %v1270_v21  ;;  %vm901_vm0 = vcmask 261312  }
 0x14c   :  { %v634_v39 = vsub.f32 1.0, %v633_v29 }
 0x14d   :  { %v500_v46 = vpop.xlane.xlu2 %499 }
 0x14e   :  { %v556_v16 = vadd.f32 %v1256_v2, %v500_v46  ;;  %v635_v49 = vmul.f32 %v1272_v24, %v634_v39 }
 0x150   :  { %v975_v20 = vmul.f32 -1.442695, %v556_v16  ;;  %v1001_v25 = vpop.eup %1000  ;;  %v636_v61 = vadd.f32 %v1272_v24, %v635_v49  ;;  %v659_v16 = vor.u32 1.1754944e-38, %v658_v62 }
 0x151   :  { %v1276_v27 = vpop.eup %1002  ;;  %v1280_v30 = vadd.f32 1.0, %v1001_v25 }
 0x152   :  { %1004 = vpow2.f32 %v975_v20  ;;  %v648_v31 = vmul.f32 %v1276_v27, %v1264_v15  ;;  %vm653_vm1 = vweird.f32 %v1276_v27  ;;  %v640_v13 = vsel %vm1322_vm3, %v1272_v24, %v636_v61 }
 0x153   :  { %1006 = vrcp.f32 %v1270_v21  ;;  %vm1336_vm6 = vmor %vm652_vm5, %vm653_vm1  ;;  %v673_v24 = vand.u32 2147483648, %v1270_v21  ;;  %vm682_vm15 = vweird.f32 %v1280_v30 }
 0x154   :  { %v649_v41 = vsub.f32 1.0, %v648_v31 }
 0x155   :  { %v503_v17 = vpop.xlane.xlu2 %502 }
 0x156   :  { %v557_v19 = vadd.f32 %v1256_v2, %v503_v17  ;;  %v650_v52 = vmul.f32 %v1276_v27, %v649_v41  ;;  %v674_v41 = vor.u32 1.1754944e-38, %v673_v24 }
 0x158   :  { %v976_v23 = vmul.f32 -1.442695, %v557_v19  ;;  %v1005_v34 = vpop.eup %1004  ;;  %v651_v63 = vadd.f32 %v1276_v27, %v650_v52 }
 0x159   :  { %v1285_v38 = vpop.eup %1006  ;;  %v1288_v42 = vadd.f32 1.0, %v1005_v34 }
 0x15a   :  { %1008 = vpow2.f32 %v976_v23  ;;  %v663_v45 = vmul.f32 %v1285_v38, %v1270_v21  ;;  %v655_v14 = vsel %vm1336_vm6, %v1276_v27, %v651_v63  ;;  %vm668_vm8 = vweird.f32 %v1285_v38 }
 0x15b   :  { %1010 = vrcp.f32 %v1280_v30  ;;  %v671_v23 = vand.u32 2147483647, %v1270_v21  ;;  %vm1367_vm12 = vmor %vm667_vm10, %vm668_vm8  ;;  %v701_v59 = vand.u32 2147483647, %v1288_v42  ;;  %v703_v63 = vand.u32 2147483648, %v1288_v42 }
 0x15c   :  { %v664_v55 = vsub.f32 1.0, %v663_v45 }
 0x15d   :  { %v506_v22 = vpop.xlane.xlu0 %505  ;;  %vm672_vm13 = vcmp.eq.f32.partialorder %v671_v23, 8.507059e+37  ;;  %vm1432_vm5 = vcmp.eq.f32.partialorder %v701_v59, 8.507059e+37 }
 0x15e   :  { %v558_v26 = vadd.f32 %v1256_v2, %v506_v22  ;;  %v665_v3 = vmul.f32 %v1285_v38, %v664_v55 }
 0x160   :  { %v977_v32 = vmul.f32 -1.442695, %v558_v26  ;;  %v1009_v40 = vpop.eup %1008  ;;  %v666_v15 = vadd.f32 %v1285_v38, %v665_v3  ;;  %v645_v26 = vsel %vm1326_vm4, %v644_v8, %v640_v13  ;;  %vm697_vm4 = vweird.f32 %v1288_v42 }
 0x161   :  { %v1294_v50 = vadd.f32 1.0, %v1009_v40  ;;  %v1298_v54 = vpop.eup %1010  ;;  %v890_v40 = vperm.slane %v645_v26, %v1300_v57 }
 0x162   :  { %1012 = vpow2.f32 %v977_v32  ;;  %v678_v0 = vmul.f32 %v1298_v54, %v1280_v30  ;;  %v1373_v32 = vadd.s32 4294967264, %v1300_v57  ;;  %v670_v21 = vsel %vm1367_vm12, %v1285_v38, %v666_v15 }
 0x163   :  { %1014 = vrcp.f32 %v1288_v42  ;;  %v688_v38 = vand.u32 2147483648, %v1280_v30  ;;  %v675_v49 = vsel %vm672_vm13, %v674_v41, %v670_v21  ;;  %vm683_vm14 = vweird.f32 %v1298_v54 }
 0x164   :  { %v679_v17 = vsub.f32 1.0, %v678_v0  ;;  %v896_v62 = vperm.slane %v675_v49, %v1332_v7  ;;  %vm1411_vm1 = vmor %vm682_vm15, %vm683_vm14  ;;  %vm712_vm8 = vweird.f32 %v1294_v50 }
 0x165   :  { %v509_v28 = vpop.xlane.xlu1 %508  ;;  %v689_v6 = vor.u32 1.1754944e-38, %v688_v38 }
 0x166   :  { %v559_v35 = vadd.f32 %v1256_v2, %v509_v28  ;;  %v660_v28 = vsel %vm657_vm9, %v659_v16, %v655_v14  ;;  %v680_v31 = vmul.f32 %v1298_v54, %v679_v17  ;;  %v1444_v17 = vadd.s32 4294967240, %v1300_v57 }
 0x167   :  { %v892_v45 = vperm.slane %v660_v28, %v1315_v33  ;;  %vm905_vm9 = vcmask 326912  }
 0x168   :  { %v978_v47 = vmul.f32 -1.442695, %v559_v35  ;;  %v1013_v56 = vpop.eup %1012 }
 0x169   :  { %v1318_v36 = vadd.f32 1.0, %v1013_v56  ;;  %v1320_v4 = vpop.eup %1014  ;;  %v894_v3 = vsel %vm893_vm7, %v892_v45, %v890_v40 }
 0x16a   :  { %1016 = vpow2.f32 %v978_v47  ;;  %v693_v19 = vmul.f32 %v1320_v4, %v1288_v42  ;;  %v686_v47 = vand.u32 2147483647, %v1280_v30  ;;  %vm698_vm3 = vweird.f32 %v1320_v4 }
 0x16b   :  { %1018 = vrcp.f32 %v1294_v50  ;;  %v898_v13 = vsel %vm897_vm11, %v896_v62, %v894_v3  ;;  %vm1439_vm6 = vmor %vm697_vm4, %vm698_vm3  ;;  %v731_v41 = vand.u32 2147483647, %v1318_v36  ;;  %vm909_vm11 = vcmask 392512  }
 0x16c   :  { %v694_v35 = vsub.f32 1.0, %v693_v19  ;;  %vm1415_vm2 = vcmp.eq.f32.partialorder %v686_v47, 8.507059e+37  ;;  %v733_v47 = vand.u32 2147483648, %v1318_v36  ;;  %vm727_vm14 = vweird.f32 %v1318_v36 }
 0x16d   :  { %v512_v37 = vpop.xlane.xlu2 %511  ;;  %v1595_v62 = vadd.s32 4294967208, %v1300_v57 }
 0x16e   :  { %v560_v43 = vadd.f32 %v1256_v2, %v512_v37  ;;  %v695_v55 = vmul.f32 %v1320_v4, %v694_v35 }
 0x170   :  { %v979_v53 = vmul.f32 -1.442695, %v560_v43  ;;  %v1017_v46 = vpop.eup %1016 }
 0x171   :  { %v1351_v18 = vpop.eup %1018  ;;  %v1360_v25 = vadd.f32 1.0, %v1017_v46  ;;  %v696_v46 = vadd.f32 %v1320_v4, %v695_v55 }
 0x172   :  { %1020 = vpow2.f32 %v979_v53  ;;  %v708_v37 = vmul.f32 %v1351_v18, %v1294_v50  ;;  %vm713_vm7 = vweird.f32 %v1351_v18 }
 0x173   :  { %1022 = vrcp.f32 %v1318_v36  ;;  %vm1468_vm10 = vmor %vm712_vm8, %vm713_vm7  ;;  %v746_v3 = vand.u32 2147483647, %v1360_v25  ;;  %vm917_vm7 = vcmask 523712  }
 0x174   :  { %v709_v56 = vsub.f32 1.0, %v708_v37 }
 0x175   :  { %v515_v51 = vpop.xlane.xlu0 %514 }
 0x176   :  { %v561_v60 = vadd.f32 %v1256_v2, %v515_v51  ;;  %v681_v51 = vadd.f32 %v1298_v54, %v680_v31  ;;  %v710_v8 = vmul.f32 %v1351_v18, %v709_v56 }
 0x178   :  { %v980_v44 = vmul.f32 -1.442695, %v561_v60  ;;  %v1021_v22 = vpop.eup %1020  ;;  %v1398_v60 = vadd.s32 4294967256, %v1300_v57  ;;  %v711_v23 = vadd.f32 %v1351_v18, %v710_v8 }
 0x179   :  { %v1381_v39 = vadd.f32 1.0, %v1021_v22  ;;  %v1385_v43 = vpop.eup %1022  ;;  %v700_v22 = vsel %vm1439_vm6, %v1320_v4, %v696_v46  ;;  %v716_v4 = vand.u32 2147483647, %v1294_v50  ;;  %vm1535_vm6 = vcmp.eq.f32.partialorder %v746_v3, 8.507059e+37 }
 0x17a   :  { %1024 = vpow2.f32 %v980_v44  ;;  %v723_v61 = vmul.f32 %v1385_v43, %v1318_v36  ;;  %v685_v44 = vsel %vm1411_vm1, %v1298_v54, %v681_v51  ;;  %v704_v54 = vor.u32 1.1754944e-38, %v703_v63 }
 0x17b   :  { %1026 = vrcp.f32 %v1360_v25  ;;  %v690_v16 = vsel %vm1415_vm2, %v689_v6, %v685_v44  ;;  %vm728_vm12 = vweird.f32 %v1385_v43  ;;  %vm717_vm13 = vcmp.eq.f32.partialorder %v716_v4, 8.507059e+37 }
 0x17c   :  { %v724_v10 = vsub.f32 1.0, %v723_v61  ;;  %v900_v31 = vperm.slane %v690_v16, %v1342_v11  ;;  %v705_v37 = vsel %vm1432_vm5, %v704_v54, %v700_v22  ;;  %vm1492_vm15 = vmor %vm727_vm14, %vm728_vm12  ;;  %vm1496_vm1 = vcmp.eq.f32.partialorder %v731_v41, 8.507059e+37 }
 0x17d   :  { %v518_v1 = vpop.xlane.xlu1 %517  ;;  %v734_v36 = vor.u32 1.1754944e-38, %v733_v47  ;;  %vm913_vm2 = vcmask 458112   ;;  %v763_v54 = vand.u32 2147483648, %v1381_v39  ;;  %v1540_v22 = vadd.s32 4294967224, %v1300_v57 }
 0x17e   :  { %v562_v12 = vadd.f32 %v1256_v2, %v518_v1  ;;  %v725_v28 = vmul.f32 %v1385_v43, %v724_v10  ;;  %vm757_vm8 = vweird.f32 %v1381_v39 }
 0x180   :  { %v981_v27 = vmul.f32 -1.442695, %v562_v12  ;;  %v1025_v48 = vpop.eup %1024  ;;  %v726_v49 = vadd.f32 %v1385_v43, %v725_v28 }
 0x181   :  { %v1404_v0 = vadd.f32 1.0, %v1025_v48  ;;  %v1406_v33 = vpop.eup %1026 }
 0x182   :  { %1028 = vpow2.f32 %v981_v27  ;;  %v738_v15 = vmul.f32 %v1406_v33, %v1360_v25  ;;  %v718_v27 = vand.u32 2147483648, %v1294_v50  ;;  %v715_v50 = vsel %vm1468_vm10, %v1351_v18, %v711_v23 }
 0x183   :  { %1030 = vrcp.f32 %v1381_v39  ;;  %v904_v18 = vperm.slane %v705_v37, %v1373_v32  ;;  %vm743_vm3 = vweird.f32 %v1406_v33  ;;  %v1543_v23 = vadd.s32 4294967216, %v1300_v57 }
 0x184   :  { %v739_v45 = vsub.f32 1.0, %v738_v15  ;;  %v719_v48 = vor.u32 1.1754944e-38, %v718_v27  ;;  %vm921_vm10 = vcmask 589312   ;;  %v776_v41 = vand.u32 2147483647, %v1404_v0 }
 0x185   :  { %v521_v20 = vpop.xlane.xlu2 %520 }
 0x186   :  { %v563_v34 = vadd.f32 %v1256_v2, %v521_v20  ;;  %v720_v55 = vsel %vm717_vm13, %v719_v48, %v715_v50  ;;  %v740_v56 = vmul.f32 %v1406_v33, %v739_v45  ;;  %v778_v45 = vand.u32 2147483648, %v1404_v0 }
 0x187   :  { %v908_v6 = vperm.slane %v720_v55, %v1398_v60  ;;  %vm772_vm13 = vweird.f32 %v1404_v0 }
 0x188   :  { %v982_v52 = vmul.f32 -1.442695, %v563_v34  ;;  %v1029_v7 = vpop.eup %1028  ;;  %v1464_v34 = vadd.s32 4294967232, %v1300_v57  ;;  %v741_v46 = vadd.f32 %v1406_v33, %v740_v56 }
 0x189   :  { %v1429_v12 = vpop.eup %1030  ;;  %v1448_v19 = vadd.f32 1.0, %v1029_v7  ;;  %v748_v7 = vand.u32 2147483648, %v1360_v25 }
 0x18a   :  { %1032 = vpow2.f32 %v982_v52  ;;  %v753_v29 = vmul.f32 %v1429_v12, %v1381_v39  ;;  %v902_v52 = vsel %vm901_vm0, %v900_v31, %v898_v13  ;;  %vm742_vm0 = vweird.f32 %v1360_v25 }
 0x18b   :  { %v761_v13 = vand.u32 2147483647, %v1381_v39  ;;  %vm758_vm4 = vweird.f32 %v1429_v12  ;;  %v906_v42 = vsel %vm905_vm9, %v904_v18, %v902_v52  ;;  %vm1531_vm5 = vmor %vm742_vm0, %vm743_vm3  ;;  %v749_v31 = vor.u32 1.1754944e-38, %v748_v7 }
 0x18c   :  { %v754_v51 = vsub.f32 1.0, %v753_v29  ;;  %v745_v25 = vsel %vm1531_vm5, %v1406_v33, %v741_v46  ;;  %vm1556_vm9 = vmor %vm757_vm8, %vm758_vm4  ;;  %v764_v33 = vor.u32 1.1754944e-38, %v763_v54  ;;  %v791_v61 = vand.u32 2147483647, %v1448_v19 }
 0x18d   :  { %v524_v53 = vpop.xlane.xlu0 %523  ;;  %v750_v40 = vsel %vm1535_vm6, %v749_v31, %v745_v25  ;;  %vm787_vm0 = vweird.f32 %v1448_v19 }
 0x18e   :  { %v564_v58 = vadd.f32 %v1256_v2, %v524_v53  ;;  %v755_v30 = vmul.f32 %v1429_v12, %v754_v51  ;;  %v916_v18 = vperm.slane %v750_v40, %v1444_v17 }
 0x190   :  { %v983_v1 = vmul.f32 -1.442695, %v564_v58  ;;  %v1033_v26 = vpop.eup %1032  ;;  %v756_v14 = vadd.f32 %v1429_v12, %v755_v30 }
 0x191   :  { %v1480_v38 = vadd.f32 1.0, %v1033_v26 }
 0x192   :  { %1034 = vpow2.f32 %v983_v1  ;;  %v730_v1 = vsel %vm1492_vm15, %v1385_v43, %v726_v49  ;;  %v760_v39 = vsel %vm1556_vm9, %v1429_v12, %v756_v14  ;;  %vm1589_vm15 = vcmp.eq.f32.partialorder %v776_v41, 8.507059e+37 }
 0x193   :  { %1036 = vrcp.f32 %v1404_v0  ;;  %v735_v10 = vsel %vm1496_vm1, %v734_v36, %v730_v1  ;;  %v793_v36 = vand.u32 2147483648, %v1448_v19  ;;  %v779_v1 = vor.u32 1.1754944e-38, %v778_v45 }
 0x194   :  { %1038 = vrcp.f32 %v1448_v19  ;;  %v912_v29 = vperm.slane %v735_v10, %v1427_v9  ;;  %v806_v46 = vand.u32 2147483647, %v1480_v38  ;;  %vm802_vm4 = vweird.f32 %v1480_v38 }
 0x195   :  { %v527_v20 = vpop.xlane.xlu1 %526 }
 0x196   :  { %v565_v24 = vadd.f32 %v1256_v2, %v527_v20  ;;  %vm1642_vm6 = vcmp.eq.f32.partialorder %v806_v46, 8.507059e+37 }
 0x198   :  { %v984_v21 = vmul.f32 -1.442695, %v565_v24  ;;  %v1035_v35 = vpop.eup %1034  ;;  %v910_v24 = vsel %vm909_vm11, %v908_v6, %v906_v42  ;;  %vm762_vm11 = vcmp.eq.f32.partialorder %v761_v13, 8.507059e+37  ;;  %v794_v13 = vor.u32 1.1754944e-38, %v793_v36 }
 0x199   :  { %v1474_v11 = vpop.eup %1036  ;;  %v1486_v53 = vadd.f32 1.0, %v1035_v35  ;;  %v765_v49 = vsel %vm762_vm11, %v764_v33, %v760_v39  ;;  %v914_v56 = vsel %vm913_vm2, %v912_v29, %v910_v24  ;;  %vm1614_vm2 = vcmp.eq.f32.partialorder %v791_v61, 8.507059e+37 }
 0x19a   :  { %1040 = vpow2.f32 %v984_v21  ;;  %v768_v58 = vmul.f32 %v1474_v11, %v1404_v0  ;;  %v1502_v63 = vpop.eup %1038  ;;  %vm773_vm12 = vweird.f32 %v1474_v11  ;;  %v920_v0 = vperm.slane %v765_v49, %v1464_v34 }
 0x19b   :  { %1042 = vrcp.f32 %v1480_v38  ;;  %v783_v60 = vmul.f32 %v1502_v63, %v1448_v19  ;;  %vm1585_vm14 = vmor %vm772_vm13, %vm773_vm12  ;;  %vm788_vm1 = vweird.f32 %v1502_v63  ;;  %v918_v6 = vsel %vm917_vm7, %v916_v18, %v914_v56 }
 0x19c   :  { %1044 = vrcp.f32 %v1486_v53  ;;  %v769_v43 = vsub.f32 1.0, %v768_v58  ;;  %v1608_v34 = vadd.s32 4294967200, %v1300_v57  ;;  %v808_v19 = vand.u32 2147483648, %v1480_v38  ;;  %vm1622_vm3 = vmor %vm787_vm0, %vm788_vm1 }
 0x19d   :  { %v530_v59 = vpop.xlane.xlu2 %529  ;;  %v784_v21 = vsub.f32 1.0, %v783_v60  ;;  %v922_v54 = vsel %vm921_vm10, %v920_v0, %v918_v6  ;;  %vm925_vm7 = vcmask 654912   ;;  %v1647_v29 = vadd.s32 4294967192, %v1300_v57 }
 0x19e   :  { %v566_v32 = vadd.f32 %v1256_v2, %v530_v59  ;;  %v770_v26 = vmul.f32 %v1474_v11, %v769_v43  ;;  %vm817_vm8 = vweird.f32 %v1486_v53  ;;  %vm929_vm12 = vcmask 720512  }
 0x19f   :  { %v785_v51 = vmul.f32 %v1502_v63, %v784_v21  ;;  %v823_v21 = vand.u32 2147483648, %v1486_v53 }
 0x1a0   :  { %v1041_v5 = vpop.eup %1040  ;;  %v985_v44 = vmul.f32 -1.442695, %v566_v32  ;;  %v771_v47 = vadd.f32 %v1474_v11, %v770_v26 }
 0x1a1   :  { %v1515_v8 = vadd.f32 1.0, %v1041_v5  ;;  %v1526_v16 = vpop.eup %1042  ;;  %v786_v3 = vadd.f32 %v1502_v63, %v785_v51  ;;  %v824_v49 = vor.u32 1.1754944e-38, %v823_v21 }
 0x1a2   :  { %1046 = vpow2.f32 %v985_v44  ;;  %v1551_v28 = vpop.eup %1044  ;;  %v798_v9 = vmul.f32 %v1526_v16, %v1480_v38  ;;  %v775_v17 = vsel %vm1585_vm14, %v1474_v11, %v771_v47  ;;  %vm803_vm5 = vweird.f32 %v1526_v16 }
 0x1a3   :  { %1048 = vrcp.f32 %v1515_v8  ;;  %v813_v12 = vmul.f32 %v1551_v28, %v1486_v53  ;;  %v1612_v11 = vsel %vm1589_vm15, %v779_v1, %v775_v17  ;;  %v790_v42 = vsel %vm1622_vm3, %v1502_v63, %v786_v3  ;;  %vm1656_vm10 = vmor %vm802_vm4, %vm803_vm5 }
 0x1a4   :  { %v799_v55 = vsub.f32 1.0, %v798_v9  ;;  %v924_v24 = vperm.slane %v1612_v11, %v1540_v22  ;;  %v809_v63 = vor.u32 1.1754944e-38, %v808_v19  ;;  %v795_v31 = vsel %vm1614_vm2, %v794_v13, %v790_v42 }
 0x1a5   :  { %v533_v27 = vpop.xlane.xlu0 %532  ;;  %v814_v32 = vsub.f32 1.0, %v813_v12  ;;  %vm818_vm9 = vweird.f32 %v1551_v28  ;;  %v821_v9 = vand.u32 2147483647, %v1486_v53  ;;  %v838_v38 = vand.u32 2147483648, %v1515_v8 }
 0x1a6   :  { %v567_v35 = vadd.f32 %v1256_v2, %v533_v27  ;;  %v800_v5 = vmul.f32 %v1526_v16, %v799_v55  ;;  %vm1670_vm14 = vmor %vm817_vm8, %vm818_vm9  ;;  %vm832_vm15 = vweird.f32 %v1515_v8  ;;  %v836_v40 = vand.u32 2147483647, %v1515_v8 }
 0x1a7   :  { %v815_v60 = vmul.f32 %v1551_v28, %v814_v32  ;;  %vm822_vm3 = vcmp.eq.f32.partialorder %v821_v9, 8.507059e+37  ;;  %v926_v36 = vsel %vm925_vm7, %v924_v24, %v922_v54  ;;  %vm933_vm8 = vcmask 786112  }
 0x1a8   :  { %v1047_v37 = vpop.eup %1046  ;;  %v986_v50 = vmul.f32 -1.442695, %v567_v35  ;;  %v801_v25 = vadd.f32 %v1526_v16, %v800_v5  ;;  %vm837_vm4 = vcmp.eq.f32.partialorder %v836_v40, 8.507059e+37  ;;  %vm937_vm9 = vcmask 851712  }
 0x1a9   :  { %v1570_v2 = vpop.eup %1048  ;;  %v1576_v48 = vadd.f32 1.0, %v1047_v37  ;;  %v816_v22 = vadd.f32 %v1551_v28, %v815_v60  ;;  %vm945_vm7 = vcmask 982912  }
 0x1aa   :  { %v828_v52 = vmul.f32 %v1570_v2, %v1515_v8  ;;  %1050 = vpow2.f32 %v986_v50  ;;  %vm833_vm11 = vweird.f32 %v1570_v2  ;;  %v805_v33 = vsel %vm1656_vm10, %v1526_v16, %v801_v25 }
 0x1ab   :  { %1052 = vrcp.f32 %v1576_v48  ;;  %v853_v41 = vand.u32 2147483648, %v1576_v48  ;;  %v928_v16 = vperm.slane %v795_v31, %v1543_v23  ;;  %vm1679_vm1 = vmor %vm832_vm15, %vm833_vm11  ;;  %vm847_vm0 = vweird.f32 %v1576_v48 }
 0x1ac   :  { %v829_v30 = vsub.f32 1.0, %v828_v52  ;;  %v820_v47 = vsel %vm1670_vm14, %v1551_v28, %v816_v22  ;;  %v851_v12 = vand.u32 2147483647, %v1576_v48  ;;  %v810_v8 = vsel %vm1642_vm6, %v809_v63, %v805_v33 }
 0x1ad   :  { %v839_v52 = vor.u32 1.1754944e-38, %v838_v38  ;;  %v943_v28 = vadd.s32 4294967184, %v1300_v57  ;;  %v825_v56 = vsel %vm822_vm3, %v824_v49, %v820_v47  ;;  %v932_v61 = vperm.slane %v810_v8, %v1595_v62 }
 0x1ae   :  { %v830_v15 = vmul.f32 %v1570_v2, %v829_v30  ;;  %vm852_vm5 = vcmp.eq.f32.partialorder %v851_v12, 8.507059e+37  ;;  %v936_v32 = vperm.slane %v825_v56, %v1608_v34  ;;  %v947_v30 = vadd.s32 4294967176, %v1300_v57 }
 0x1af   :  { %v930_v5 = vsel %vm929_vm12, %v928_v16, %v926_v36  ;;  %vm949_vm15 = vcmask 1048512  }
 0x1b0   :  { %v1051_v7 = vpop.eup %1050  ;;  %v831_v35 = vadd.f32 %v1570_v2, %v830_v15  ;;  %v934_v11 = vsel %vm933_vm8, %v932_v61, %v930_v5 }
 0x1b1   :  { %v1620_v43 = vpop.eup %1052  ;;  %v1627_v14 = vadd.f32 1.0, %v1051_v7  ;;  %v938_v44 = vsel %vm937_vm9, %v936_v32, %v934_v11 }
 0x1b2   :  { %v843_v20 = vmul.f32 %v1620_v43, %v1576_v48  ;;  %vm848_vm13 = vweird.f32 %v1620_v43  ;;  %v835_v23 = vsel %vm1679_vm1, %v1570_v2, %v831_v35  ;;  %v854_v48 = vor.u32 1.1754944e-38, %v853_v41 }
 0x1b3   :  { %1054 = vrcp.f32 %v1627_v14  ;;  %vm849_vm2 = vmor %vm847_vm0, %vm848_vm13  ;;  %v840_v58 = vsel %vm837_vm4, %v839_v52, %v835_v23  ;;  %v868_v59 = vand.u32 2147483648, %v1627_v14  ;;  %v866_v17 = vand.u32 2147483647, %v1627_v14 }
 0x1b4   :  { %v844_v27 = vsub.f32 1.0, %v843_v20  ;;  %vm862_vm10 = vweird.f32 %v1627_v14  ;;  %v940_v3 = vperm.slane %v840_v58, %v1647_v29  ;;  %vm941_vm13 = vcmask 917312  }
 0x1b5   :  { %v869_v62 = vor.u32 1.1754944e-38, %v868_v59  ;;  %vm867_vm14 = vcmp.eq.f32.partialorder %v866_v17, 8.507059e+37 }
 0x1b6   :  { %v845_v39 = vmul.f32 %v1620_v43, %v844_v27  ;;  %v942_v57 = vsel %vm941_vm13, %v940_v3, %v938_v44 }
 0x1b8   :  { %v846_v45 = vadd.f32 %v1620_v43, %v845_v39 }
 0x1b9   :  { %v1055_v50 = vpop.eup %1054 }
 0x1ba   :  { %v858_v51 = vmul.f32 %v1055_v50, %v1627_v14  ;;  %v850_v18 = vsel %vm849_vm2, %v1620_v43, %v846_v45  ;;  %vm863_vm6 = vweird.f32 %v1055_v50 }
 0x1bb   :  { %v855_v0 = vsel %vm852_vm5, %v854_v48, %v850_v18  ;;  %vm864_vm11 = vmor %vm862_vm10, %vm863_vm6 }
 0x1bc   :  { %v859_v55 = vsub.f32 1.0, %v858_v51  ;;  %v944_v6 = vperm.slane %v855_v0, %v943_v28 }
 0x1be   :  { %v860_v2 = vmul.f32 %v1055_v50, %v859_v55  ;;  %v946_v19 = vsel %vm945_vm7, %v944_v6, %v942_v57 }
 0x1c0   :  { %v861_v1 = vadd.f32 %v1055_v50, %v860_v2 }
 0x1c2   :  { %v865_v7 = vsel %vm864_vm11, %v1055_v50, %v861_v1 }
 0x1c3   :  { %v870_v34 = vsel %vm867_vm14, %v869_v62, %v865_v7 }
 0x1c4   :  { %v948_v46 = vperm.slane %v870_v34, %v947_v30 }
 0x1c6   :  { %v950_v43 = vsel %vm949_vm15, %v948_v46, %v946_v19 }
 0x1c7   :  { %952 = vst [vmem:[#allocation8] sm:$0x1] %v950_v43 }
 0x1c8   :  { %963 = dma.vmem_to_hbm [thread:$0]  %s959_s7, 16, %s961_s10, [#allocation5]  }
 0x1c9   :  { %1132 = dma.done.wait [#allocation5], 16  }
 0x1ca   :  { %1133 = vsyncadd [#allocation5], 4294967280 }
 0x1cb   :  { %968 = vsyncpa [#allocation4], 1 }
 0x1cc   :  { %969 = vsyncpa [#allocation7], 1 }
 0x1cd   :  { %970 = vsyncpa [#allocation5], 1 }

</bundles_post_ra>
